<compile_context>
chip_gen: v5e
topology: v5e:2x2
jax: 0.10.0
libtpu: 0.0.40
codegen_flags: <defaults>
</compile_context>

<pallas_src>
import math
from functools import partial

import jax
import jax.numpy as jnp
from jax.experimental import pallas as pl
from jax.experimental.pallas import tpu as pltpu

_INV_SQRT2 = 1.0 / math.sqrt(2.0)


def _ffn_kernel(x_ref, w1a_ref, w1g_ref, b1a_ref, b1g_ref, w2_ref, b2_ref,
                o_ref, acc_ref):
    # x_ref:   (tm, dim_p)   compute dtype (bf16 by default)
    # w1a_ref: (dim_p, tk)   value half of the first projection (k-tile)
    # w1g_ref: (dim_p, tk)   gate half of the first projection (k-tile)
    # b1a/b1g: (1, tk)       f32
    # w2_ref:  (tk, dim_p)   second projection (k-tile)
    # b2_ref:  (1, dim_p)    f32
    # o_ref:   (tm, dim_p)
    # acc_ref: (tm, dim_p)   f32 accumulator over the hidden (k) axis
    k = pl.program_id(1)

    @pl.when(k == 0)
    def _init():
        acc_ref[...] = jnp.zeros_like(acc_ref)

    x = x_ref[...]
    a = jnp.dot(x, w1a_ref[...], preferred_element_type=jnp.float32) + b1a_ref[...]
    g = jnp.dot(x, w1g_ref[...], preferred_element_type=jnp.float32) + b1g_ref[...]

    # Exact (erf-based) GELU, matching torch.nn.functional.gelu's default.
    gelu_g = 0.5 * g * (1.0 + jax.lax.erf(g * _INV_SQRT2))
    u = (a * gelu_g).astype(w2_ref.dtype)      # GEGLU output k-tile (tm, tk)

    acc_ref[...] += jnp.dot(u, w2_ref[...], preferred_element_type=jnp.float32)

    @pl.when(k == pl.num_programs(1) - 1)
    def _finalize():
        # Dropout(p=0.0) is the identity (eval semantics).
        o_ref[...] = (acc_ref[...] + b2_ref[...]).astype(o_ref.dtype)


def _round_up(n, m):
    return ((n + m - 1) // m) * m


@partial(jax.jit, static_argnames=("tm", "tk", "compute_dtype"))
def feed_forward_pallas(x, w1, b1, w2, b2, *, tm=256, tk=512,
                        compute_dtype=jnp.bfloat16):
    """x: (batch, seq, dim).  w1: (dim, 2*hidden), w2: (hidden, dim)."""
    batch, seq, dim = x.shape
    two_hidden = w1.shape[1]
    hidden = two_hidden // 2
    assert w1.shape == (dim, two_hidden)
    assert b1.shape == (two_hidden,)
    assert w2.shape == (hidden, dim)
    assert b2.shape == (dim,)

    # Split the fused first projection into value / gate halves (GEGLU order
    # matches torch.chunk: first half = value, second half = gates).
    w1a, w1g = w1[:, :hidden], w1[:, hidden:]
    b1a, b1g = b1[:hidden], b1[hidden:]

    M = batch * seq
    # Padded sizes: lane dims -> multiples of 128 (lane-dense, unmasked vst),
    # rows -> multiple of the row tile.  Padding is zeros and contributes
    # nothing (gelu(0)=0), and padded rows/cols are sliced away below.
    dim_p = _round_up(dim, 128)
    tm_eff = min(tm, _round_up(M, 8))
    M_p = _round_up(M, tm_eff)
    tk_eff = min(tk, _round_up(hidden, 128))
    hid_p = _round_up(hidden, tk_eff)

    cdt = jnp.dtype(compute_dtype)
    x2d = jnp.pad(x.reshape(M, dim),
                  ((0, M_p - M), (0, dim_p - dim))).astype(compute_dtype)
    w1a_p = jnp.pad(w1a, ((0, dim_p - dim), (0, hid_p - hidden))).astype(compute_dtype)
    w1g_p = jnp.pad(w1g, ((0, dim_p - dim), (0, hid_p - hidden))).astype(compute_dtype)
    w2_p = jnp.pad(w2, ((0, hid_p - hidden), (0, dim_p - dim))).astype(compute_dtype)
    b1a_p = jnp.pad(b1a, (0, hid_p - hidden)).reshape(1, hid_p).astype(jnp.float32)
    b1g_p = jnp.pad(b1g, (0, hid_p - hidden)).reshape(1, hid_p).astype(jnp.float32)
    b2_p = jnp.pad(b2, (0, dim_p - dim)).reshape(1, dim_p).astype(jnp.float32)

    grid = (M_p // tm_eff, hid_p // tk_eff)

    cost = pl.CostEstimate(
        flops=6 * M_p * dim_p * hid_p,
        transcendentals=M_p * hid_p,
        bytes_accessed=(
            x2d.size * cdt.itemsize
            + M_p * dim_p * jnp.dtype(x.dtype).itemsize
            + (w1a_p.size + w1g_p.size + w2_p.size) * cdt.itemsize
            + (b1a_p.size + b1g_p.size + b2_p.size) * 4
        ),
    )

    out2d = pl.pallas_call(
        _ffn_kernel,
        out_shape=jax.ShapeDtypeStruct((M_p, dim_p), x.dtype),
        grid_spec=pltpu.PrefetchScalarGridSpec(
            num_scalar_prefetch=0,
            grid=grid,
            in_specs=[
                pl.BlockSpec((tm_eff, dim_p), lambda i, k: (i, 0)),   # x rows
                pl.BlockSpec((dim_p, tk_eff), lambda i, k: (0, k)),   # w1a k-tile
                pl.BlockSpec((dim_p, tk_eff), lambda i, k: (0, k)),   # w1g k-tile
                pl.BlockSpec((1, tk_eff), lambda i, k: (0, k)),       # b1a
                pl.BlockSpec((1, tk_eff), lambda i, k: (0, k)),       # b1g
                pl.BlockSpec((tk_eff, dim_p), lambda i, k: (k, 0)),   # w2 k-tile
                pl.BlockSpec((1, dim_p), lambda i, k: (0, 0)),        # b2
            ],
            out_specs=pl.BlockSpec((tm_eff, dim_p), lambda i, k: (i, 0)),
            scratch_shapes=[pltpu.VMEM((tm_eff, dim_p), jnp.float32)],
        ),
        compiler_params=pltpu.CompilerParams(
            # rows: independent (megacore shardable); hidden k: reduction.
            dimension_semantics=("parallel", "arbitrary"),
        ),
        cost_estimate=cost,
    )(x2d, w1a_p, w1g_p, b1a_p, b1g_p, w2_p, b2_p)

    return out2d[:M, :dim].reshape(batch, seq, dim)


def feed_forward_ref(x, w1, b1, w2, b2, compute_dtype=jnp.float32):
    """Pure-JAX reference matching the PyTorch module.  With
    compute_dtype=bf16 it mirrors the kernel's operand precision
    (f32 accumulation) for a matched-precision comparison."""
    cd = compute_dtype
    h = jnp.dot(x.astype(cd), w1.astype(cd),
                preferred_element_type=jnp.float32) + b1
    a, g = jnp.split(h, 2, axis=-1)
    u = a * jax.nn.gelu(g, approximate=False)
    return jnp.dot(u.astype(cd), w2.astype(cd),
                   preferred_element_type=jnp.float32) + b2


if __name__ == "__main__":
    # Small shapes consistent with the module's forward: (batch, seq, dim).
    batch, seq, dim, mult = 2, 8, 32, 4
    hidden = dim * mult                      # 128
    two_hidden = hidden * 2                  # 256

    key = jax.random.PRNGKey(0)
    kx, kw1, kb1, kw2, kb2 = jax.random.split(key, 5)

    x = jax.random.normal(kx, (batch, seq, dim), dtype=jnp.float32)

    # Deterministic parameter init (uniform, like nn.Linear's scale).
    # Weights stored in (in, out) layout so y = x @ W + b.
    lim1 = 1.0 / math.sqrt(dim)
    w1 = jax.random.uniform(kw1, (dim, two_hidden), jnp.float32, -lim1, lim1)
    b1 = jax.random.uniform(kb1, (two_hidden,), jnp.float32, -lim1, lim1)
    lim2 = 1.0 / math.sqrt(hidden)
    w2 = jax.random.uniform(kw2, (hidden, dim), jnp.float32, -lim2, lim2)
    b2 = jax.random.uniform(kb2, (dim,), jnp.float32, -lim2, lim2)

    out = feed_forward_pallas(x, w1, b1, w2, b2)
    out = jax.block_until_ready(out)
    assert out.shape == (batch, seq, dim)

    # Matched-precision reference (bf16 operands, f32 accumulation).
    ref_matched = feed_forward_ref(x, w1, b1, w2, b2, compute_dtype=jnp.bfloat16)
    # Full-f32 reference (exact module semantics).
    ref_f32 = feed_forward_ref(x, w1, b1, w2, b2)

    err_matched = float(jnp.max(jnp.abs(out - ref_matched)))
    err_f32 = float(jnp.max(jnp.abs(out - ref_f32)))
    assert jnp.allclose(out, ref_matched, atol=2e-3, rtol=2e-3), (
        f"matched-precision max abs err = {err_matched}")
    assert jnp.allclose(out, ref_f32, atol=5e-2, rtol=5e-2), (
        f"f32-reference max abs err = {err_f32}")

    print("KERNEL_OK")
</pallas_src>

<mosaic_0001>
module attributes {stable_mosaic.version = 11 : i64} {
  func.func @_ffn_kernel(%arg0: i32, %arg1: i32, %arg2: memref<16x128xbf16, #tpu.memory_space<vmem>>, %arg3: memref<128x128xbf16, #tpu.memory_space<vmem>>, %arg4: memref<128x128xbf16, #tpu.memory_space<vmem>>, %arg5: memref<1x128xf32, #tpu.memory_space<vmem>>, %arg6: memref<1x128xf32, #tpu.memory_space<vmem>>, %arg7: memref<128x128xbf16, #tpu.memory_space<vmem>>, %arg8: memref<1x128xf32, #tpu.memory_space<vmem>>, %arg9: memref<16x128xf32, #tpu.memory_space<vmem>>, %arg10: memref<16x128xf32, #tpu.memory_space<vmem>>) attributes {dimension_semantics = [#tpu.dimension_semantics<parallel>, #tpu.dimension_semantics<arbitrary>], iteration_bounds = array<i64: 1, 1>, scalar_prefetch = 0 : i64, scratch_operands = 1 : i64, tpu.core_type = #tpu.core_type<tc>, window_params = [{transform_indices = @transform_0, window_bounds = array<i64: 16, 128>}, {transform_indices = @transform_1, window_bounds = array<i64: 128, 128>}, {transform_indices = @transform_2, window_bounds = array<i64: 128, 128>}, {transform_indices = @transform_3, window_bounds = array<i64: 1, 128>}, {transform_indices = @transform_4, window_bounds = array<i64: 1, 128>}, {transform_indices = @transform_5, window_bounds = array<i64: 128, 128>}, {pipeline_mode = #tpu.pipeline_mode<synchronous>, transform_indices = @transform_6, window_bounds = array<i64: 1, 128>}, {transform_indices = @transform_7, window_bounds = array<i64: 16, 128>}]} {
    %c0_i32 = arith.constant 0 : i32
    %0 = arith.cmpi eq, %arg1, %c0_i32 : i32
    %1 = arith.extui %0 : i1 to i32
    %c0_i32_0 = arith.constant 0 : i32
    %2 = arith.cmpi ne, %1, %c0_i32_0 : i32
    scf.if %2 {
      %cst_23 = arith.constant 0.000000e+00 : f32
      %32 = vector.broadcast %cst_23 : f32 to vector<16x128xf32>
      %c0_24 = arith.constant 0 : index
      %c0_25 = arith.constant 0 : index
      %33 = vector.load %arg10[%c0_24, %c0_25] : memref<16x128xf32, #tpu.memory_space<vmem>>, vector<16x128xf32>
      tpu.vector_store %arg10[%c0_24, %c0_25], %32 {strides = array<i32>} : memref<16x128xf32, #tpu.memory_space<vmem>>, vector<16x128xf32>,
    } else {
    }
    %c0 = arith.constant 0 : index
    %c0_1 = arith.constant 0 : index
    %3 = vector.load %arg2[%c0, %c0_1] : memref<16x128xbf16, #tpu.memory_space<vmem>>, vector<16x128xbf16>
    %c0_2 = arith.constant 0 : index
    %c0_3 = arith.constant 0 : index
    %4 = vector.load %arg3[%c0_2, %c0_3] : memref<128x128xbf16, #tpu.memory_space<vmem>>, vector<128x128xbf16>
    %cst = arith.constant dense<0.000000e+00> : vector<16x128xf32>
    %5 = tpu.matmul %3, %4, %cst {dimension_numbers = #tpu.dot_dimension_numbers<[1], [0], [0], [1], [0, 0, 1, 1], [], []>} : vector<16x128xbf16>, vector<128x128xbf16>, vector<16x128xf32> -> vector<16x128xf32>
    %c0_4 = arith.constant 0 : index
    %c0_5 = arith.constant 0 : index
    %6 = vector.load %arg5[%c0_4, %c0_5] : memref<1x128xf32, #tpu.memory_space<vmem>>, vector<1x128xf32>
    %7 = vector.broadcast %6 : vector<1x128xf32> to vector<16x128xf32>
    %8 = arith.addf %5, %7 : vector<16x128xf32>
    %c0_6 = arith.constant 0 : index
    %c0_7 = arith.constant 0 : index
    %9 = vector.load %arg4[%c0_6, %c0_7] : memref<128x128xbf16, #tpu.memory_space<vmem>>, vector<128x128xbf16>
    %cst_8 = arith.constant dense<0.000000e+00> : vector<16x128xf32>
    %10 = tpu.matmul %3, %9, %cst_8 {dimension_numbers = #tpu.dot_dimension_numbers<[1], [0], [0], [1], [0, 0, 1, 1], [], []>} : vector<16x128xbf16>, vector<128x128xbf16>, vector<16x128xf32> -> vector<16x128xf32>
    %c0_9 = arith.constant 0 : index
    %c0_10 = arith.constant 0 : index
    %11 = vector.load %arg6[%c0_9, %c0_10] : memref<1x128xf32, #tpu.memory_space<vmem>>, vector<1x128xf32>
    %12 = vector.broadcast %11 : vector<1x128xf32> to vector<16x128xf32>
    %13 = arith.addf %10, %12 : vector<16x128xf32>
    %cst_11 = arith.constant 5.000000e-01 : f32
    %14 = vector.broadcast %cst_11 : f32 to vector<16x128xf32>
    %15 = arith.mulf %14, %13 : vector<16x128xf32>
    %cst_12 = arith.constant 0.707106769 : f32
    %16 = vector.broadcast %cst_12 : f32 to vector<16x128xf32>
    %17 = arith.mulf %13, %16 : vector<16x128xf32>
    %18 = math.erf %17 : vector<16x128xf32>
    %cst_13 = arith.constant 1.000000e+00 : f32
    %19 = vector.broadcast %cst_13 : f32 to vector<16x128xf32>
    %20 = arith.addf %19, %18 : vector<16x128xf32>
    %21 = arith.mulf %15, %20 : vector<16x128xf32>
    %22 = arith.mulf %8, %21 : vector<16x128xf32>
    %23 = arith.truncf %22 : vector<16x128xf32> to vector<16x128xbf16>
    %c0_14 = arith.constant 0 : index
    %c0_15 = arith.constant 0 : index
    %24 = vector.load %arg10[%c0_14, %c0_15] : memref<16x128xf32, #tpu.memory_space<vmem>>, vector<16x128xf32>
    %c0_16 = arith.constant 0 : index
    %c0_17 = arith.constant 0 : index
    %25 = vector.load %arg7[%c0_16, %c0_17] : memref<128x128xbf16, #tpu.memory_space<vmem>>, vector<128x128xbf16>
    %cst_18 = arith.constant dense<0.000000e+00> : vector<16x128xf32>
    %26 = tpu.matmul %23, %25, %cst_18 {dimension_numbers = #tpu.dot_dimension_numbers<[1], [0], [0], [1], [0, 0, 1, 1], [], []>} : vector<16x128xbf16>, vector<128x128xbf16>, vector<16x128xf32> -> vector<16x128xf32>
    %27 = arith.addf %24, %26 : vector<16x128xf32>
    %c0_19 = arith.constant 0 : index
    %c0_20 = arith.constant 0 : index
    %28 = vector.load %arg10[%c0_19, %c0_20] : memref<16x128xf32, #tpu.memory_space<vmem>>, vector<16x128xf32>
    tpu.vector_store %arg10[%c0_19, %c0_20], %27 {strides = array<i32>} : memref<16x128xf32, #tpu.memory_space<vmem>>, vector<16x128xf32>,
    %c0_i32_21 = arith.constant 0 : i32
    %29 = arith.cmpi eq, %arg1, %c0_i32_21 : i32
    %30 = arith.extui %29 : i1 to i32
    %c0_i32_22 = arith.constant 0 : i32
    %31 = arith.cmpi ne, %30, %c0_i32_22 : i32
    scf.if %31 {
      %c0_23 = arith.constant 0 : index
      %c0_24 = arith.constant 0 : index
      %32 = vector.load %arg10[%c0_23, %c0_24] : memref<16x128xf32, #tpu.memory_space<vmem>>, vector<16x128xf32>
      %c0_25 = arith.constant 0 : index
      %c0_26 = arith.constant 0 : index
      %33 = vector.load %arg8[%c0_25, %c0_26] : memref<1x128xf32, #tpu.memory_space<vmem>>, vector<1x128xf32>
      %34 = vector.broadcast %33 : vector<1x128xf32> to vector<16x128xf32>
      %35 = arith.addf %32, %34 : vector<16x128xf32>
      %c0_27 = arith.constant 0 : index
      %c0_28 = arith.constant 0 : index
      %36 = vector.load %arg9[%c0_27, %c0_28] : memref<16x128xf32, #tpu.memory_space<vmem>>, vector<16x128xf32>
      tpu.vector_store %arg9[%c0_27, %c0_28], %35 {strides = array<i32>} : memref<16x128xf32, #tpu.memory_space<vmem>>, vector<16x128xf32>,
    } else {
    }
    return
  }
  func.func @transform_0(%arg0: i32, %arg1: i32) -> (i32, i32) {
    %c0_i32 = arith.constant 0 : i32
    %c0_i32_0 = arith.constant 0 : i32
    return %arg0, %c0_i32 : i32, i32
  }
  func.func @transform_1(%arg0: i32, %arg1: i32) -> (i32, i32) {
    %c0_i32 = arith.constant 0 : i32
    %c0_i32_0 = arith.constant 0 : i32
    return %c0_i32, %arg1 : i32, i32
  }
  func.func @transform_2(%arg0: i32, %arg1: i32) -> (i32, i32) {
    %c0_i32 = arith.constant 0 : i32
    %c0_i32_0 = arith.constant 0 : i32
    return %c0_i32, %arg1 : i32, i32
  }
  func.func @transform_3(%arg0: i32, %arg1: i32) -> (i32, i32) {
    %c0_i32 = arith.constant 0 : i32
    %c0_i32_0 = arith.constant 0 : i32
    return %c0_i32, %arg1 : i32, i32
  }
  func.func @transform_4(%arg0: i32, %arg1: i32) -> (i32, i32) {
    %c0_i32 = arith.constant 0 : i32
    %c0_i32_0 = arith.constant 0 : i32
    return %c0_i32, %arg1 : i32, i32
  }
  func.func @transform_5(%arg0: i32, %arg1: i32) -> (i32, i32) {
    %c0_i32 = arith.constant 0 : i32
    %c0_i32_0 = arith.constant 0 : i32
    return %arg1, %c0_i32 : i32, i32
  }
  func.func @transform_6(%arg0: i32, %arg1: i32) -> (i32, i32) {
    %c0_i32 = arith.constant 0 : i32
    %c0_i32_0 = arith.constant 0 : i32
    %c0_i32_1 = arith.constant 0 : i32
    return %c0_i32, %c0_i32_0 : i32, i32
  }
  func.func @transform_7(%arg0: i32, %arg1: i32) -> (i32, i32) {
    %c0_i32 = arith.constant 0 : i32
    %c0_i32_0 = arith.constant 0 : i32
    return %arg0, %c0_i32 : i32, i32
  }
}

</mosaic_0001>

<bundles_post_ra>
// kernel: feed_forward_pallas.1
= control target key start
LH: loop header
LB: loop body
LE: loop exit
PB: predicated region body
PF: predicated region fallthrough
CT: control target
= control target key end

     0   :  { %s678_s2 = inlined_call_operand.vmem [shape: bf16[128,128], index: 2, kind: input, shape index: {}]   ;;  %s679_s1 = inlined_call_operand.vmem [shape: bf16[128,128], index: 1, kind: input, shape index: {}]   ;;  %s680_s4 = inlined_call_operand.vmem [shape: f32[1,128], index: 4, kind: input, shape index: {}]   ;;  %s681_s0 = inlined_call_operand.vmem [shape: bf16[16,128], index: 0, kind: input, shape index: {}]   ;;  %s682_s3 = inlined_call_operand.vmem [shape: f32[1,128], index: 3, kind: input, shape index: {}]   ;;  %s683_s6 = inlined_call_operand.vmem [shape: f32[1,128], index: 6, kind: input, shape index: {}]   ;;  %s684_s5 = inlined_call_operand.vmem [shape: bf16[128,128], index: 5, kind: input, shape index: {}]   ;;  %s685_s7 = inlined_call_operand.vmem [shape: f32[16,128], index: 7, kind: output, shape index: {}]  }
   0x1   :  { %v514_v0 = vld [vmem:[%s678_s2 + $0x38] sm:$0xff]  ;;  %v513_v1 = vld [vmem:[%s678_s2 + $0x30] sm:$0xff]  ;;  %v512_v4 = vld [vmem:[%s678_s2 + $0x28] sm:$0xff] }
   0x2   :  { %190 = vmatpush.bf16.msra.mxu1 %v514_v0  ;;  %v506_v2 = vld [vmem:[%s679_s1 + $0x38] sm:$0xff]  ;;  %v505_v3 = vld [vmem:[%s679_s1 + $0x30] sm:$0xff]  ;;  %v504_v5 = vld [vmem:[%s679_s1 + $0x28] sm:$0xff] }
   0x3   :  { %108 = vmatpush.bf16.msra.mxu0 %v506_v2  ;;  %v511_v6 = vld [vmem:[%s678_s2 + $0x20] sm:$0xff]  ;;  %v510_v8 = vld [vmem:[%s678_s2 + $0x18] sm:$0xff]  ;;  %v509_v10 = vld [vmem:[%s678_s2 + $0x10] sm:$0xff] }
   0x4   :  { %v503_v7 = vld [vmem:[%s679_s1 + $0x20] sm:$0xff]  ;;  %v502_v9 = vld [vmem:[%s679_s1 + $0x18] sm:$0xff]  ;;  %v501_v11 = vld [vmem:[%s679_s1 + $0x10] sm:$0xff] }
   0x5   :  { %v508_v12 = vld [vmem:[%s678_s2 + $0x8] sm:$0xff]  ;;  %v507_v14 = vld [vmem:[%s678_s2] sm:$0xff]  ;;  %v522_v21 = vld [vmem:[%s684_s5 + $0x38] sm:$0xff] }
   0x6   :  { %191 = vmatpush.bf16.msra.mxu1 %v513_v1  ;;  %v500_v13 = vld [vmem:[%s679_s1 + $0x8] sm:$0xff]  ;;  %v498_v15 = vld [vmem:[%s681_s0] sm:$0xff]  ;;  %361 = vmatpush.bf16.msra.mxu2 %v522_v21  ;;  %v521_v24 = vld [vmem:[%s684_s5 + $0x30] sm:$0xff] }
   0x7   :  { %109 = vmatpush.bf16.msra.mxu0 %v505_v3  ;;  %v499_v16 = vld [vmem:[%s679_s1] sm:$0xff]  ;;  %v520_v31 = vld [vmem:[%s684_s5 + $0x28] sm:$0xff]  ;;  %v518_v44 = vld [vmem:[%s684_s5 + $0x18] sm:$0xff] }
   0x8   :  { %v523_v17 = vld [vmem:[%s680_s4] ss:$0 sm:$0xff]  ;;  %v517_v52 = vld [vmem:[%s684_s5 + $0x10] sm:$0xff]  ;;  %v516_v59 = vld [vmem:[%s684_s5 + $0x8] sm:$0xff] }
   0x9   :  { %v519_v37 = vld [vmem:[%s684_s5 + $0x20] sm:$0xff] }
   0xa   :  { %192 = vmatpush.bf16.msra.mxu1 %v512_v4  ;;  %362 = vmatpush.bf16.msra.mxu2 %v521_v24  ;;  %v515_v0 = vld [vmem:[%s684_s5] sm:$0xff] }
   0xb   :  { %110 = vmatpush.bf16.msra.mxu0 %v504_v5 }
   0xe   :  { %193 = vmatpush.bf16.msra.mxu1 %v511_v6  ;;  %363 = vmatpush.bf16.msra.mxu2 %v520_v31 }
   0xf   :  { %111 = vmatpush.bf16.msra.mxu0 %v503_v7 }
  0x12   :  { %194 = vmatpush.bf16.msra.mxu1 %v510_v8  ;;  %364 = vmatpush.bf16.msra.mxu2 %v519_v37 }
  0x13   :  { %112 = vmatpush.bf16.msra.mxu0 %v502_v9 }
  0x16   :  { %195 = vmatpush.bf16.msra.mxu1 %v509_v10  ;;  %365 = vmatpush.bf16.msra.mxu2 %v518_v44 }
  0x17   :  { %113 = vmatpush.bf16.msra.mxu0 %v501_v11 }
  0x1a   :  { %196 = vmatpush.bf16.msra.mxu1 %v508_v12  ;;  %366 = vmatpush.bf16.msra.mxu2 %v517_v52 }
  0x1b   :  { %114 = vmatpush.bf16.msra.mxu0 %v500_v13 }
  0x1e   :  { %197 = vmatpush.bf16.msra.mxu1 %v507_v14  ;;  %367 = vmatpush.bf16.msra.mxu2 %v516_v59 }
  0x1f   :  { %115 = vmatpush.bf16.msra.mxu0 %v499_v16 }
  0x21   :  { %198 = vmatmul.bf16.vlgmr.msra.gmra.mxu1 %v498_v15 }
  0x22   :  { %116 = vmatmul.bf16.vlgmr.msra.gmra.mxu0 %v498_v15  ;;  %368 = vmatpush.bf16.msra.mxu2 %v515_v0 }
  0x9e   :  { %v199_v18 = vpop.f32.mrf.mxu1 }
  0x9f   :  { %v624_v19 = vadd.f32 %v523_v17, %v199_v18 }
  0xa1   :  { %v627_v20 = vmul.f32 0.70710677, %v624_v19 }
  0xa3   :  { %v208_v22 = vmul.f32 %v627_v20, %v627_v20 }
  0xa5   :  { %v209_v23 = vmin.f32 %v208_v22, 16.0 }
  0xa6   :  { %v201_v25 = vpop.f32.mrf.mxu1 }
  0xa7   :  { %v210_v26 = vmul.f32 2.1237322e-06, %v209_v23  ;;  %v221_v27 = vmul.f32 3.8918573e-05, %v209_v23  ;;  %v637_v28 = vadd.f32 %v523_v17, %v201_v25 }
  0xa9   :  { %v211_v29 = vadd.f32 0.00028619796, %v210_v26  ;;  %v222_v30 = vadd.f32 0.001143296, %v221_v27  ;;  %v643_v32 = vmul.f32 0.70710677, %v637_v28 }
  0xab   :  { %v212_v33 = vmul.f32 %v211_v29, %v209_v23  ;;  %v223_v34 = vmul.f32 %v222_v30, %v209_v23  ;;  %v248_v35 = vmul.f32 %v643_v32, %v643_v32  ;;  %v117_v30 = vpop.f32.mrf.mxu0 }
  0xad   :  { %v224_v36 = vadd.f32 0.014752088, %v223_v34  ;;  %v249_v38 = vmin.f32 %v248_v35, 16.0  ;;  %v213_v39 = vadd.f32 0.0036580483, %v212_v33 }
  0xaf   :  { %v225_v40 = vmul.f32 %v224_v36, %v209_v23  ;;  %v250_v41 = vmul.f32 2.1237322e-06, %v249_v38  ;;  %v261_v42 = vmul.f32 3.8918573e-05, %v249_v38  ;;  %v214_v47 = vmul.f32 %v213_v39, %v209_v23 }
  0xb1   :  { %v226_v43 = vadd.f32 0.112945676, %v225_v40  ;;  %v251_v45 = vadd.f32 0.00028619796, %v250_v41  ;;  %v262_v46 = vadd.f32 0.001143296, %v261_v42 }
  0xb2   :  { %v215_v54 = vadd.f32 0.05243302, %v214_v47  ;;  %v524_v41 = vld [vmem:[%s682_s3] ss:$0 sm:$0xff] }
  0xb3   :  { %v227_v48 = vmul.f32 %v226_v43, %v209_v23  ;;  %v252_v49 = vmul.f32 %v251_v45, %v249_v38  ;;  %v263_v50 = vmul.f32 %v262_v46, %v249_v38  ;;  %v204_v43 = vmul.f32 0.5, %v624_v19  ;;  %v119_v45 = vpop.f32.mrf.mxu0 }
  0xb4   :  { %v216_v61 = vmul.f32 %v215_v54, %v209_v23  ;;  %v205_v46 = vmul.f32 0.5, %v637_v28  ;;  %v118_v47 = vadd.f32 %v524_v41, %v117_v30  ;;  %v525_v54 = vld [vmem:[%s683_s6] ss:$0 sm:$0xff] }
  0xb5   :  { %v228_v51 = vadd.f32 0.4994258, %v227_v48  ;;  %v264_v53 = vadd.f32 0.014752088, %v263_v50  ;;  %v253_v56 = vadd.f32 0.0036580483, %v252_v49  ;;  %v120_v50 = vadd.f32 %v524_v41, %v119_v45 }
  0xb6   :  { %v217_v2 = vadd.f32 0.18741608, %v216_v61 }
  0xb7   :  { %v229_v55 = vmul.f32 %v228_v51, %v209_v23  ;;  %v265_v57 = vmul.f32 %v264_v53, %v249_v38  ;;  %v254_v62 = vmul.f32 %v253_v56, %v249_v38 }
  0xb8   :  { %v218_v8 = vmul.f32 %v217_v2, %v209_v23 }
  0xb9   :  { %v230_v58 = vadd.f32 1.0, %v229_v55  ;;  %v266_v60 = vadd.f32 0.112945676, %v265_v57  ;;  %v255_v3 = vadd.f32 0.05243302, %v254_v62 }
  0xba   :  { %v219_v14 = vadd.f32 1.1283791, %v218_v8 }
  0xbb   :  { %526 = vrcp.f32 %v230_v58  ;;  %v267_v63 = vmul.f32 %v266_v60, %v249_v38  ;;  %v256_v9 = vmul.f32 %v255_v3, %v249_v38  ;;  %v242_v11 = vand.u32 2147483648, %v230_v58 }
  0xbc   :  { %v240_v13 = vand.u32 2147483647, %v230_v58  ;;  %vm236_vm1 = vweird.f32 %v230_v58  ;;  %v220_v22 = vmul.f32 %v219_v14, %v627_v20 }
  0xbd   :  { %v268_v1 = vadd.f32 0.4994258, %v267_v63  ;;  %v257_v15 = vadd.f32 0.18741608, %v256_v9  ;;  %v243_v17 = vor.u32 1.1754944e-38, %v242_v11 }
  0xbe   :  { %vm241_vm3 = vcmp.eq.f32.partialorder %v240_v13, 8.507059e+37 }
  0xbf   :  { %v269_v4 = vmul.f32 %v268_v1, %v249_v38  ;;  %v258_v23 = vmul.f32 %v257_v15, %v249_v38 }
  0xc1   :  { %v527_v5 = vpop.eup %526  ;;  %v270_v7 = vadd.f32 1.0, %v269_v4  ;;  %v259_v31 = vadd.f32 1.1283791, %v258_v23 }
  0xc2   :  { %v232_v6 = vmul.f32 %v527_v5, %v230_v58  ;;  %vm237_vm0 = vweird.f32 %v527_v5 }
  0xc3   :  { %528 = vrcp.f32 %v270_v7  ;;  %vm238_vm2 = vmor %vm236_vm1, %vm237_vm0  ;;  %v282_v29 = vand.u32 2147483648, %v270_v7  ;;  %v280_v34 = vand.u32 2147483647, %v270_v7  ;;  %vm276_vm5 = vweird.f32 %v270_v7 }
  0xc4   :  { %v233_v10 = vsub.f32 1.0, %v232_v6  ;;  %v260_v39 = vmul.f32 %v259_v31, %v643_v32 }
  0xc5   :  { %v283_v37 = vor.u32 1.1754944e-38, %v282_v29  ;;  %vm281_vm7 = vcmp.eq.f32.partialorder %v280_v34, 8.507059e+37 }
  0xc6   :  { %v234_v12 = vmul.f32 %v527_v5, %v233_v10 }
  0xc8   :  { %v235_v16 = vadd.f32 %v527_v5, %v234_v12 }
  0xc9   :  { %v529_v18 = vpop.eup %528 }
  0xca   :  { %v239_v21 = vsel %vm238_vm2, %v527_v5, %v235_v16  ;;  %v272_v25 = vmul.f32 %v529_v18, %v270_v7  ;;  %vm277_vm4 = vweird.f32 %v529_v18 }
  0xcb   :  { %v244_v24 = vsel %vm241_vm3, %v243_v17, %v239_v21  ;;  %vm278_vm6 = vmor %vm276_vm5, %vm277_vm4 }
  0xcc   :  { %v245_v26 = vmul.f32 %v244_v24, %v220_v22  ;;  %v273_v27 = vsub.f32 1.0, %v272_v25 }
  0xce   :  { %v274_v33 = vmul.f32 %v529_v18, %v273_v27  ;;  %v464_v36 = vclamps-f32 %v245_v26, 1.0 }
  0xd0   :  { %v275_v35 = vadd.f32 %v529_v18, %v274_v33  ;;  %v288_v42 = vadd.f32 1.0, %v464_v36 }
  0xd2   :  { %v279_v40 = vsel %vm278_vm6, %v529_v18, %v275_v35  ;;  %v290_v48 = vmul.f32 %v288_v42, %v204_v43 }
  0xd3   :  { %v284_v20 = vsel %vm281_vm7, %v283_v37, %v279_v40 }
  0xd4   :  { %v285_v38 = vmul.f32 %v284_v20, %v260_v39  ;;  %v292_v51 = vmul.f32 %v290_v48, %v118_v47 }
  0xd6   :  { %v465_v44 = vclamps-f32 %v285_v38, 1.0 }
  0xd8   :  { %v289_v49 = vadd.f32 1.0, %v465_v44 }
  0xda   :  { %v291_v32 = vmul.f32 %v289_v49, %v205_v46 }
  0xdc   :  { %v293_v52 = vmul.f32 %v291_v32, %v120_v50 }
  0xde   :  { %v294_v53 = vpack.c.bf16 %v293_v52, %v292_v51 }
  0xe0   :  { %369 = vmatmul.bf16.vlgmr.msra.gmra.mxu2 %v294_v53 }
 0x163   :  { %v370_v55 = vpop.f32.mrf.mxu2 }
 0x164   :  { %v388_v56 = vadd.f32 %v525_v54, %v370_v55 }
 0x166   :  { %390 = vst [vmem:[%s685_s7] sm:$0xff] %v388_v56 }
 0x16b   :  { %v372_v19 = vpop.f32.mrf.mxu2 }
 0x16c   :  { %v389_v28 = vadd.f32 %v525_v54, %v372_v19 }
 0x16e   :  { %391 = vst [vmem:[%s685_s7 + $0x8] sm:$0xff] %v389_v28 }

</bundles_post_ra>
